<compile_context>
chip_gen: v6e
topology: v6e:2x2x1
jax: 0.10.0
libtpu: 0.0.40
codegen_flags: <defaults>
</compile_context>

<pallas_src>
import jax
import jax.numpy as jnp
from jax import lax
from jax.experimental import pallas as pl
from jax.experimental.pallas import tpu as pltpu


def model_kernel(x_ref, w_ref, b_ref, out_ref):
    # x_ref : SMEM f32[4] = x1 flattened row-major [x00, x01, x10, x11]
    # w_ref : SMEM f32[4] = Linear weight flattened row-major [w00, w01, w10, w11]
    # b_ref : SMEM f32[2] = Linear bias [b0, b1]
    # out_ref: VMEM f32[1, 2, 2]

    # ---------------- scalar phase (scalar ALU, SMEM operands) ----------------
    x00, x01, x10, x11 = x_ref[0], x_ref[1], x_ref[2], x_ref[3]
    w00, w01, w10, w11 = w_ref[0], w_ref[1], w_ref[2], w_ref[3]
    b0, b1 = b_ref[0], b_ref[1]

    # Effective linear weight: Wp[o, k] = W[o, k] + b[k]
    wp00 = w00 + b0
    wp01 = w01 + b1
    wp10 = w10 + b0
    wp11 = w11 + b1

    # x1-independent chain (was hoisted into the wrapper; now in-kernel scalar ops).
    v5_0 = (w00 + w10) * 0.5              # mean(W, dim=0)
    v5_1 = (w01 + w11) * 0.5
    v6_0 = jnp.maximum(v5_0, 0.0)         # relu
    v6_1 = jnp.maximum(v5_1, 0.0)
    v8 = jnp.maximum((v6_0 + v6_1) * 0.5, 0.0)          # relu(mean(v6))
    v10_0 = v8 * v5_0                      # mean(W^T * v8, dim=1) = v8 * v5
    v10_1 = v8 * v5_1
    v11_0 = jnp.maximum(v10_0, 0.0)
    v11_1 = jnp.maximum(v10_1, 0.0)
    v14 = jnp.maximum((v11_0 * v11_0 + v11_1 * v11_1) * 0.5, 0.0)   # relu(mean(v11^2))
    lo0 = v6_0 - 2.0                       # clamp lower bound per output feature
    lo1 = v6_1 - 2.0
    hi0 = v10_0                            # clamp upper bound per output feature
    hi1 = v10_1

    # v1 = x1.permute(0, 2, 1):  v1[i, j] = x1[j, i]
    #   v1[0,0]=x00, v1[0,1]=x10, v1[1,0]=x01, v1[1,1]=x11
    # v2 = F.linear(v1, Wp, b):  v2[i, j] = sum_k v1[i, k] * Wp[j, k] + b[j]
    v2_00 = x00 * wp00 + x10 * wp01 + b0
    v2_01 = x00 * wp10 + x10 * wp11 + b1
    v2_10 = x01 * wp00 + x11 * wp01 + b0
    v2_11 = x01 * wp10 + x11 * wp11 + b1

    # Per-column (j) maxima over the softmax axis (i) for numerical stability,
    # exactly as torch's softmax / log_softmax do.
    m2_0 = jnp.maximum(v2_00, v2_10)
    m2_1 = jnp.maximum(v2_01, v2_11)
    m1_0 = jnp.maximum(x00, x01)           # max_i v1[i, 0]
    m1_1 = jnp.maximum(x10, x11)           # max_i v1[i, 1]

    a2_00 = v2_00 - m2_0
    a2_01 = v2_01 - m2_1
    a2_10 = v2_10 - m2_0
    a2_11 = v2_11 - m2_1
    a1_00 = x00 - m1_0
    a1_01 = x10 - m1_1
    a1_10 = x01 - m1_0
    a1_11 = x11 - m1_1

    # ---------------- vector phase (VPU/EUP, 8 selects, 2 exp, 1 log) ----------------
    shape = (1, 2, 2)
    i0 = lax.broadcasted_iota(jnp.int32, shape, 1) == 0   # axis-1 (sublane) selector
    j0 = lax.broadcasted_iota(jnp.int32, shape, 2) == 0   # axis-2 (lane) selector

    arg2 = jnp.where(i0, jnp.where(j0, a2_00, a2_01), jnp.where(j0, a2_10, a2_11))
    arg1 = jnp.where(i0, jnp.where(j0, a1_00, a1_01), jnp.where(j0, a1_10, a1_11))
    lo_t = jnp.where(j0, lo0, lo1)
    hi_t = jnp.where(j0, hi0, hi1)

    # softmax(v2, dim=1): exp / per-column sum, exact division (review request).
    e2 = jnp.exp(arg2)
    d2 = jnp.sum(e2, axis=1, keepdims=True)
    p2 = e2 / d2

    # v3 = log_softmax(v1, dim=1)  (invalid .view repaired as identity).
    e1 = jnp.exp(arg1)
    d1 = jnp.sum(e1, axis=1, keepdims=True)
    v3 = arg1 - jnp.log(d1)

    # v15 = softmax(v2) + v14 ; v16 = clamp(v15, v6 - 2, v10) (torch clamp = max then min).
    v15 = p2 + v14
    v16 = jnp.minimum(jnp.maximum(v15, lo_t), hi_t)

    out_ref[...] = v3 * v16


@jax.jit
def model_forward(x1, W, b):
    """x1: (1, 2, 2) f32; W: (2, 2) Linear weight; b: (2,) Linear bias -> (1, 2, 2) f32."""
    assert x1.shape == (1, 2, 2), "kernel specialized to the module's fixed (1, 2, 2) input"

    x1 = x1.astype(jnp.float32)
    W = W.astype(jnp.float32)
    b = b.astype(jnp.float32)

    # No wrapper-side arithmetic: only metadata reshapes so the SMEM refs are 1-D
    # (1-D SMEM avoids the [8, 128]-word 2-D padding).
    return pl.pallas_call(
        model_kernel,
        out_shape=jax.ShapeDtypeStruct((1, 2, 2), jnp.float32),
        in_specs=[
            pl.BlockSpec(memory_space=pltpu.MemorySpace.SMEM),   # x1, flattened (4 scalars)
            pl.BlockSpec(memory_space=pltpu.MemorySpace.SMEM),   # W, flattened (4 scalars)
            pl.BlockSpec(memory_space=pltpu.MemorySpace.SMEM),   # b (2 scalars)
        ],
        out_specs=pl.BlockSpec(memory_space=pltpu.MemorySpace.VMEM),
        cost_estimate=pl.CostEstimate(flops=96, transcendentals=6, bytes_accessed=128),
    )(x1.reshape(-1), W.reshape(-1), b)


def model_reference(x1, W, b):
    """Pure-jnp reference with the same repaired semantics (for correctness check)."""
    v1 = jnp.transpose(x1, (0, 2, 1))
    Wp = W + b[None, :]
    # v2[b, i, o] = sum_k v1[b, i, k] * Wp[o, k] + b[o]   (elementwise; avoids MXU precision)
    v2 = jnp.sum(v1[:, :, None, :] * Wp[None, None, :, :], axis=-1) + b
    v2s = jax.nn.softmax(v2, axis=1)
    v3 = jax.nn.log_softmax(v1, axis=1)
    v5 = jnp.mean(W, axis=0)
    v6 = jnp.maximum(v5, 0.0)
    v8 = jnp.maximum(jnp.mean(v6), 0.0)
    v10 = v8 * v5
    v11 = jnp.maximum(v10, 0.0)
    v14 = jnp.maximum(jnp.mean(v11 * v11), 0.0)
    v15 = v2s + v14
    v16 = jnp.minimum(jnp.maximum(v15, v6 - 2.0), v10)
    return v3 * v16


if __name__ == "__main__":
    key = jax.random.PRNGKey(0)
    k_x, k_w, k_b = jax.random.split(key, 3)

    # Input per the original script: torch.randn(1, 2, 2)
    x1 = jax.random.normal(k_x, (1, 2, 2), dtype=jnp.float32)

    # Deterministic nn.Linear(2, 2) init: uniform(-1/sqrt(in), 1/sqrt(in))
    bound = 1.0 / (2.0 ** 0.5)
    W = jax.random.uniform(k_w, (2, 2), jnp.float32, -bound, bound)
    b = jax.random.uniform(k_b, (2,), jnp.float32, -bound, bound)

    out = model_forward(x1, W, b)
    jax.block_until_ready(out)
    assert out.shape == (1, 2, 2) and out.dtype == jnp.float32

    ref = model_reference(x1, W, b)
    assert bool(jnp.allclose(out, ref, rtol=1e-5, atol=1e-5)), (out, ref)
    print("KERNEL_OK")
</pallas_src>

<mosaic_0001>
module attributes {stable_mosaic.version = 11 : i64} {
  func.func @model_kernel(%arg0: memref<4xf32, #tpu.memory_space<smem>>, %arg1: memref<4xf32, #tpu.memory_space<smem>>, %arg2: memref<2xf32, #tpu.memory_space<smem>>, %arg3: memref<1x2x2xf32, #tpu.memory_space<vmem>>) attributes {dimension_semantics = [], scalar_prefetch = 0 : i64, scratch_operands = 0 : i64, tpu.core_type = #tpu.core_type<tc>} {
    %c0 = arith.constant 0 : index
    %0 = memref.load %arg0[%c0] : memref<4xf32, #tpu.memory_space<smem>>
    %c1 = arith.constant 1 : index
    %1 = memref.load %arg0[%c1] : memref<4xf32, #tpu.memory_space<smem>>
    %c2 = arith.constant 2 : index
    %2 = memref.load %arg0[%c2] : memref<4xf32, #tpu.memory_space<smem>>
    %c3 = arith.constant 3 : index
    %3 = memref.load %arg0[%c3] : memref<4xf32, #tpu.memory_space<smem>>
    %c0_0 = arith.constant 0 : index
    %4 = memref.load %arg1[%c0_0] : memref<4xf32, #tpu.memory_space<smem>>
    %c1_1 = arith.constant 1 : index
    %5 = memref.load %arg1[%c1_1] : memref<4xf32, #tpu.memory_space<smem>>
    %c2_2 = arith.constant 2 : index
    %6 = memref.load %arg1[%c2_2] : memref<4xf32, #tpu.memory_space<smem>>
    %c3_3 = arith.constant 3 : index
    %7 = memref.load %arg1[%c3_3] : memref<4xf32, #tpu.memory_space<smem>>
    %c0_4 = arith.constant 0 : index
    %8 = memref.load %arg2[%c0_4] : memref<2xf32, #tpu.memory_space<smem>>
    %c1_5 = arith.constant 1 : index
    %9 = memref.load %arg2[%c1_5] : memref<2xf32, #tpu.memory_space<smem>>
    %10 = arith.addf %4, %8 : f32
    %11 = arith.addf %5, %9 : f32
    %12 = arith.addf %6, %8 : f32
    %13 = arith.addf %7, %9 : f32
    %14 = arith.addf %4, %6 : f32
    %cst = arith.constant 5.000000e-01 : f32
    %15 = arith.mulf %14, %cst : f32
    %16 = arith.addf %5, %7 : f32
    %cst_6 = arith.constant 5.000000e-01 : f32
    %17 = arith.mulf %16, %cst_6 : f32
    %cst_7 = arith.constant 0.000000e+00 : f32
    %18 = arith.maximumf %15, %cst_7 : f32
    %cst_8 = arith.constant 0.000000e+00 : f32
    %19 = arith.maximumf %17, %cst_8 : f32
    %20 = arith.addf %18, %19 : f32
    %cst_9 = arith.constant 5.000000e-01 : f32
    %21 = arith.mulf %20, %cst_9 : f32
    %cst_10 = arith.constant 0.000000e+00 : f32
    %22 = arith.maximumf %21, %cst_10 : f32
    %23 = arith.mulf %22, %15 : f32
    %24 = arith.mulf %22, %17 : f32
    %cst_11 = arith.constant 0.000000e+00 : f32
    %25 = arith.maximumf %23, %cst_11 : f32
    %cst_12 = arith.constant 0.000000e+00 : f32
    %26 = arith.maximumf %24, %cst_12 : f32
    %27 = arith.mulf %25, %25 : f32
    %28 = arith.mulf %26, %26 : f32
    %29 = arith.addf %27, %28 : f32
    %cst_13 = arith.constant 5.000000e-01 : f32
    %30 = arith.mulf %29, %cst_13 : f32
    %cst_14 = arith.constant 0.000000e+00 : f32
    %31 = arith.maximumf %30, %cst_14 : f32
    %cst_15 = arith.constant 2.000000e+00 : f32
    %32 = arith.subf %18, %cst_15 : f32
    %cst_16 = arith.constant 2.000000e+00 : f32
    %33 = arith.subf %19, %cst_16 : f32
    %34 = arith.mulf %0, %10 : f32
    %35 = arith.mulf %2, %11 : f32
    %36 = arith.addf %34, %35 : f32
    %37 = arith.addf %36, %8 : f32
    %38 = arith.mulf %0, %12 : f32
    %39 = arith.mulf %2, %13 : f32
    %40 = arith.addf %38, %39 : f32
    %41 = arith.addf %40, %9 : f32
    %42 = arith.mulf %1, %10 : f32
    %43 = arith.mulf %3, %11 : f32
    %44 = arith.addf %42, %43 : f32
    %45 = arith.addf %44, %8 : f32
    %46 = arith.mulf %1, %12 : f32
    %47 = arith.mulf %3, %13 : f32
    %48 = arith.addf %46, %47 : f32
    %49 = arith.addf %48, %9 : f32
    %50 = arith.maximumf %37, %45 : f32
    %51 = arith.maximumf %41, %49 : f32
    %52 = arith.maximumf %0, %1 : f32
    %53 = arith.maximumf %2, %3 : f32
    %54 = arith.subf %37, %50 : f32
    %55 = arith.subf %41, %51 : f32
    %56 = arith.subf %45, %50 : f32
    %57 = arith.subf %49, %51 : f32
    %58 = arith.subf %0, %52 : f32
    %59 = arith.subf %2, %53 : f32
    %60 = arith.subf %1, %52 : f32
    %61 = arith.subf %3, %53 : f32
    %62 = tpu.iota {dimensions = array<i32: 1>} : vector<1x2x2xi32>
    %c0_i32 = arith.constant 0 : i32
    %63 = vector.broadcast %c0_i32 : i32 to vector<1x2x2xi32>
    %64 = arith.cmpi eq, %62, %63 : vector<1x2x2xi32>
    %65 = tpu.iota {dimensions = array<i32: 2>} : vector<1x2x2xi32>
    %c0_i32_17 = arith.constant 0 : i32
    %66 = vector.broadcast %c0_i32_17 : i32 to vector<1x2x2xi32>
    %67 = arith.cmpi eq, %65, %66 : vector<1x2x2xi32>
    %68 = vector.broadcast %54 : f32 to vector<1x2x2xf32>
    %69 = vector.broadcast %55 : f32 to vector<1x2x2xf32>
    %70 = arith.select %67, %68, %69 : vector<1x2x2xi1>, vector<1x2x2xf32>
    %71 = vector.broadcast %56 : f32 to vector<1x2x2xf32>
    %72 = vector.broadcast %57 : f32 to vector<1x2x2xf32>
    %73 = arith.select %67, %71, %72 : vector<1x2x2xi1>, vector<1x2x2xf32>
    %74 = arith.select %64, %70, %73 : vector<1x2x2xi1>, vector<1x2x2xf32>
    %75 = vector.broadcast %58 : f32 to vector<1x2x2xf32>
    %76 = vector.broadcast %59 : f32 to vector<1x2x2xf32>
    %77 = arith.select %67, %75, %76 : vector<1x2x2xi1>, vector<1x2x2xf32>
    %78 = vector.broadcast %60 : f32 to vector<1x2x2xf32>
    %79 = vector.broadcast %61 : f32 to vector<1x2x2xf32>
    %80 = arith.select %67, %78, %79 : vector<1x2x2xi1>, vector<1x2x2xf32>
    %81 = arith.select %64, %77, %80 : vector<1x2x2xi1>, vector<1x2x2xf32>
    %82 = vector.broadcast %32 : f32 to vector<1x2x2xf32>
    %83 = vector.broadcast %33 : f32 to vector<1x2x2xf32>
    %84 = arith.select %67, %82, %83 : vector<1x2x2xi1>, vector<1x2x2xf32>
    %85 = vector.broadcast %23 : f32 to vector<1x2x2xf32>
    %86 = vector.broadcast %24 : f32 to vector<1x2x2xf32>
    %87 = arith.select %67, %85, %86 : vector<1x2x2xi1>, vector<1x2x2xf32>
    %88 = math.exp %74 : vector<1x2x2xf32>
    %cst_18 = arith.constant dense<0.000000e+00> : vector<1x2xf32>
    %89 = vector.multi_reduction <add>, %88, %cst_18 [1] : vector<1x2x2xf32> to vector<1x2xf32>
    %90 = vector.shape_cast %89 : vector<1x2xf32> to vector<1x1x2xf32>
    %91 = vector.broadcast %90 : vector<1x1x2xf32> to vector<1x2x2xf32>
    %92 = arith.divf %88, %91 : vector<1x2x2xf32>
    %93 = math.exp %81 : vector<1x2x2xf32>
    %cst_19 = arith.constant dense<0.000000e+00> : vector<1x2xf32>
    %94 = vector.multi_reduction <add>, %93, %cst_19 [1] : vector<1x2x2xf32> to vector<1x2xf32>
    %95 = vector.shape_cast %94 : vector<1x2xf32> to vector<1x1x2xf32>
    %96 = math.log %95 : vector<1x1x2xf32>
    %97 = vector.broadcast %96 : vector<1x1x2xf32> to vector<1x2x2xf32>
    %98 = arith.subf %81, %97 : vector<1x2x2xf32>
    %99 = vector.broadcast %31 : f32 to vector<1x2x2xf32>
    %100 = arith.addf %92, %99 : vector<1x2x2xf32>
    %101 = arith.maximumf %100, %84 : vector<1x2x2xf32>
    %102 = arith.minimumf %101, %87 : vector<1x2x2xf32>
    %103 = arith.mulf %98, %102 : vector<1x2x2xf32>
    %c0_20 = arith.constant 0 : index
    %c0_21 = arith.constant 0 : index
    %c0_22 = arith.constant 0 : index
    %104 = vector.load %arg3[%c0_20, %c0_21, %c0_22] : memref<1x2x2xf32, #tpu.memory_space<vmem>>, vector<1x2x2xf32>
    tpu.vector_store %arg3[%c0_20, %c0_21, %c0_22], %103 {strides = array<i32>} : memref<1x2x2xf32, #tpu.memory_space<vmem>>, vector<1x2x2xf32>,
    return
  }
}

</mosaic_0001>

<bundles_post_ra>
// kernel: model_forward.1
= control target key start
LH: loop header
LB: loop body
LE: loop exit
PB: predicated region body
PF: predicated region fallthrough
CT: control target
= control target key end

     0   :  { %s406_s0 = inlined_call_operand.vmem [shape: f32[4], index: 0, kind: input, shape index: {}]   ;;  %s407_s1 = inlined_call_operand.vmem [shape: f32[4], index: 1, kind: input, shape index: {}]   ;;  %s408_s2 = inlined_call_operand.vmem [shape: f32[2], index: 2, kind: input, shape index: {}]   ;;  %s409_s3 = inlined_call_operand.hbm [shape: f32[1,2,2], index: 3, kind: output, shape index: {}]  }
   0x1   :  { %410 = sst [smem:[#allocation12_spill]] %s409_s3 }
   0x2   :  { %8 = vsyncpa [#allocation4], 0 }
   0x3   :  { %9 = vsyncpa [#allocation6], 0  ;;  %s27_s14 = sshll.u32 %s407_s1, 4  ;;  %s28_s14 = int_to_ptr.vmem [resolvable:$true] %s27_s14 }
   0x4   :  { %10 = vsyncpa [#allocation3], 0  ;;  %s17_s17 = sshll.u32 %s406_s0, 4  ;;  %s207_s18 = scalar_lea.vmem %s28_s14, 16  ;;  %s18_s17 = int_to_ptr.vmem [resolvable:$true] %s17_s17 }
   0x5   :  { %p208_p0 = scmp.ne.s32.totalorder %s28_s14, %s207_s18  ;;  %p212_p1 = scmp.lt.s32.totalorder %s28_s14, %s28_s14 }
   0x6   :  { %p213_p2 = scmp.lt.s32.totalorder %s207_s18, %s207_s18 }
   0x8   :  { %p214_p3 = por %p213_p2, %p212_p1 }
   0xa   :  { %p215_p4 = pnand %p214_p3, %p208_p0 }
   0xc   :  { %218 = shalt.err (!%p215_p4)
}
   0xd   :  { %s269_s19 = smov [#allocation5]   ;;  %s219_s20 = scalar_lea.vmem %s18_s17, 16 }
   0xe   :  { %30 = dma.vmem_to_smem %s28_s14, 16, %s269_s19, [#allocation6]  }
   0xf   :  { %p220_p5 = scmp.ne.s32.totalorder %s18_s17, %s219_s20  ;;  %p224_p6 = scmp.lt.s32.totalorder %s18_s17, %s18_s17 }
  0x10   :  { %p225_p7 = scmp.lt.s32.totalorder %s219_s20, %s219_s20 }
  0x12   :  { %p226_p8 = por %p225_p7, %p224_p6 }
  0x14   :  { %p227_p9 = pnand %p226_p8, %p220_p5 }
  0x16   :  { %230 = shalt.err (!%p227_p9)
}
  0x17   :  { %s270_s1 = smov [#allocation2]   ;;  %s37_s22 = sshll.u32 %s408_s2, 4  ;;  %s38_s22 = int_to_ptr.vmem [resolvable:$true] %s37_s22 }
  0x18   :  { %20 = dma.vmem_to_smem %s18_s17, 16, %s270_s1, [#allocation4]  }
  0x19   :  { %s231_s23 = scalar_lea.vmem %s38_s22, 16  ;;  %p236_p11 = scmp.lt.s32.totalorder %s38_s22, %s38_s22 }
  0x1a   :  { %p232_p10 = scmp.ne.s32.totalorder %s38_s22, %s231_s23  ;;  %p237_p12 = scmp.lt.s32.totalorder %s231_s23, %s231_s23 }
  0x1c   :  { %p238_p13 = por %p237_p12, %p236_p11 }
  0x1e   :  { %p239_p0 = pnand %p238_p13, %p232_p10 }
  0x20   :  { %242 = shalt.err (!%p239_p0)
}
  0x21   :  { %s271_s24 = smov [#allocation7]  }
  0x22   :  { %40 = dma.vmem_to_smem %s38_s22, 16, %s271_s24, [#allocation6]  }
  0x23   :  { %263 = dma.done.wait [#allocation4], 16  }
  0x24   :  { %264 = vsyncadd [#allocation4], 4294967280 }
  0x25   :  { %265 = dma.done.wait [#allocation6], 32  }
  0x26   :  { %266 = vsyncadd [#allocation6], 4294967264 }
  0x27   :  { %50 = sfence }
  0x28   :  { %s303_s25 = sld [smem:[#allocation2]]  ;;  %v113_v0 = vlaneseq  ;;  %vm141_vm2 = vcmask 9216  }
  0x29   :  { %s305_s2 = sld [smem:[#allocation5]] }
  0x2a   :  { %s307_s26 = sld [smem:[#allocation5 + $0x1]]  ;;  %v343_v1 = vand.u32 127, %v113_v0  ;;  %v114_v4 = vshrl.u32 %v113_v0, 7 }
  0x2b   :  { %s309_s27 = sld [smem:[#allocation5 + $0x2]] }
  0x2c   :  { %s311_s28 = sld [smem:[#allocation7]]  ;;  %vm118_vm0 = vcmp.eq.s32.totalorder %v343_v1, 0  ;;  %vm115_vm1 = vcmp.eq.s32.totalorder %v114_v4, 0 }
  0x2d   :  { %s313_s29 = sld [smem:[#allocation7 + $0x1]] }
  0x2e   :  { %s315_s30 = sld [smem:[#allocation5 + $0x3]] }
  0x2f   :  { %s186_s4 = sld [smem:[#allocation2 + $0x2]] }
  0x30   :  { %s317_s5 = sld [smem:[#allocation2 + $0x1]] }
  0x31   :  { %s319_s6 = sld [smem:[#allocation2 + $0x3]] }
  0x32   :  { %s61_s7 = sadd.f32 %s311_s28, %s305_s2 }
  0x33   :  { %s62_s8 = sadd.f32 %s313_s29, %s307_s26 }
  0x34   :  { %s327_s9 = sadd.f32 %s309_s27, %s311_s28  ;;  %s85_s11 = smul.f32 %s61_s7, %s303_s25 }
  0x35   :  { %s331_s10 = sadd.f32 %s313_s29, %s315_s30  ;;  %s86_s12 = smul.f32 %s186_s4, %s62_s8 }
  0x36   :  { %s103_s13 = smax.f32 %s317_s5, %s303_s25  ;;  %s89_s14 = smul.f32 %s327_s9, %s303_s25 }
  0x37   :  { %s104_s15 = smax.f32 %s319_s6, %s186_s4  ;;  %s90_s16 = smul.f32 %s186_s4, %s331_s10 }
  0x38   :  { %s109_s17 = ssub.f32 %s303_s25, %s103_s13  ;;  %s93_s1 = smul.f32 %s317_s5, %s61_s7 }
  0x39   :  { %s87_s18 = sadd.f32 %s86_s12, %s85_s11  ;;  %s94_s21 = smul.f32 %s319_s6, %s62_s8 }
  0x3a   :  { %s110_s19 = ssub.f32 %s186_s4, %s104_s15  ;;  %s97_s24 = smul.f32 %s317_s5, %s327_s9  ;;  %v126_v2 = vstv %s109_s17 }
  0x3b   :  { %s91_s20 = sadd.f32 %s90_s16, %s89_s14  ;;  %s98_s25 = smul.f32 %s319_s6, %s331_s10 }
  0x3c   :  { %s88_s0 = sadd.f32 %s87_s18, %s311_s28  ;;  %v127_v3 = vstv %s110_s19 }
  0x3d   :  { %s111_s22 = ssub.f32 %s317_s5, %s103_s13  ;;  %v128_v6 = vsel %vm118_vm0, %v126_v2, %v127_v3 }
  0x3e   :  { %s348_s23 = sadd.f32 %s313_s29, %s91_s20 }
  0x3f   :  { %s95_s3 = sadd.f32 %s94_s21, %s93_s1  ;;  %v129_v5 = vstv %s111_s22 }
  0x40   :  { %s112_s11 = ssub.f32 %s319_s6, %s104_s15  ;;  %s272_s15 = smov 0.0  }
  0x41   :  { %s96_s4 = sadd.f32 %s95_s3, %s311_s28 }
  0x42   :  { %s99_s7 = sadd.f32 %s98_s25, %s97_s24  ;;  %v130_v7 = vstv %s112_s11  ;;  %s273_s11 = smov [#allocation8]  }
  0x43   :  { %s101_s5 = smax.f32 %s96_s4, %s88_s0  ;;  %v131_v8 = vsel %vm118_vm0, %v129_v5, %v130_v7  ;;  %s65_s12 = sadd.f32 %s309_s27, %s305_s2 }
  0x44   :  { %s100_s6 = sadd.f32 %s313_s29, %s99_s7  ;;  %v363_v9 = vsel %vm115_vm1, %v128_v6, %v131_v8 }
  0x45   :  { %s105_s8 = ssub.f32 %s88_s0, %s101_s5  ;;  %v151_v10 = vmul.f32 1.442695, %v363_v9  ;;  %s66_s29 = smul.f32 0.5, %s65_s12 }
  0x46   :  { %s102_s3 = smax.f32 %s100_s6, %s348_s23  ;;  %s107_s28 = ssub.f32 %s96_s4, %s101_s5 }
  0x47   :  { %s106_s9 = ssub.f32 %s348_s23, %s102_s3  ;;  %v119_v11 = vstv %s105_s8  ;;  %199 = vpow2.f32 %v151_v10  ;;  %s378_s16 = smax.f32 %s272_s15, %s66_s29 }
  0x48   :  { %s108_s10 = ssub.f32 %s100_s6, %s102_s3  ;;  %v122_v12 = vstv %s107_s28  ;;  %s175_s4 = sshll.u32 %s273_s11, 4  ;;  %s176_s4 = int_to_ptr.vmem [resolvable:$true] %s175_s4 }
  0x49   :  { %v120_v13 = vstv %s106_s9  ;;  %s67_s13 = sadd.f32 %s315_s30, %s307_s26  ;;  %s243_s7 = scalar_lea.vmem %s176_s4, 32 }
  0x4a   :  { %v121_v14 = vsel %vm118_vm0, %v119_v11, %v120_v13  ;;  %v123_v15 = vstv %s108_s10  ;;  %s192_s23 = sadd.f32 -2.0, %s378_s16  ;;  %p244_p1 = scmp.ne.s32.totalorder %s176_s4, %s243_s7 }
  0x4b   :  { %v124_v16 = vsel %vm118_vm0, %v122_v12, %v123_v15  ;;  %s68_s14 = smul.f32 0.5, %s67_s13  ;;  %p248_p2 = scmp.lt.s32.totalorder %s176_s4, %s176_s4 }
  0x4c   :  { %v125_v17 = vsel %vm115_vm1, %v121_v14, %v124_v16  ;;  %v133_v36 = vstv %s192_s23  ;;  %p249_p3 = scmp.lt.s32.totalorder %s243_s7, %s243_s7 }
  0x4d   :  { %v139_v18 = vmul.f32 1.442695, %v125_v17  ;;  %s381_s2 = smax.f32 %s272_s15, %s68_s14 }
  0x4e   :  { %s71_s26 = sadd.f32 %s381_s2, %s378_s16  ;;  %p250_p4 = por %p249_p3, %p248_p2 }
  0x4f   :  { %201 = vpow2.f32 %v139_v18  ;;  %s193_s24 = sadd.f32 -2.0, %s381_s2 }
  0x50   :  { %s72_s27 = smul.f32 0.5, %s71_s26  ;;  %p251_p5 = pnand %p250_p4, %p244_p1 }
  0x51   :  { %v134_v37 = vstv %s193_s24 }
  0x52   :  { %s73_s30 = smax.f32 %s272_s15, %s72_s27  ;;  %v135_v44 = vsel %vm118_vm0, %v133_v36, %v134_v37 }
  0x53   :  { %s388_s17 = smul.f32 %s73_s30, %s66_s29 }
  0x54   :  { %v200_v19 = vpop.eup %199  ;;  %s75_s18 = smul.f32 %s73_s30, %s68_s14 }
  0x55   :  { %v153_v20 = vsel %vm141_vm2, %v200_v19, 0.0  ;;  %s76_s19 = smax.f32 %s272_s15, %s388_s17  ;;  %v136_v40 = vstv %s388_s17 }
  0x56   :  { %v154_v21 = vrot.slane %v153_v20, 4  ;;  %s77_s20 = smax.f32 %s272_s15, %s75_s18  ;;  %s78_s1 = smul.f32 %s76_s19, %s76_s19  ;;  %v137_v41 = vstv %s75_s18 }
  0x57   :  { %s79_s0 = smul.f32 %s77_s20, %s77_s20  ;;  %v138_v46 = vsel %vm118_vm0, %v136_v40, %v137_v41 }
  0x58   :  { %v155_v22 = vadd.f32 %v154_v21, %v153_v20 }
  0x59   :  { %s80_s21 = sadd.f32 %s79_s0, %s78_s1 }
  0x5a   :  { %v156_v23 = vrot.slane %v155_v22, 2 }
  0x5b   :  { %s81_s22 = smul.f32 0.5, %s80_s21 }
  0x5c   :  { %v202_v24 = vpop.eup %201  ;;  %v157_v25 = vadd.f32 %v156_v23, %v155_v22 }
  0x5d   :  { %v142_v26 = vsel %vm141_vm2, %v202_v24, 0.0  ;;  %s82_s25 = smax.f32 %s272_s15, %s81_s22 }
  0x5e   :  { %v143_v27 = vrot.slane %v142_v26, 4  ;;  %v158_v29 = vrot.slane %v157_v25, 1  ;;  %v163_v39 = vstv %s82_s25 }
  0x60   :  { %v144_v28 = vadd.f32 %v143_v27, %v142_v26  ;;  %v159_v32 = vadd.f32 %v158_v29, %v157_v25 }
  0x62   :  { %v145_v30 = vrot.slane %v144_v28, 2  ;;  %203 = vlog2.f32 %v159_v32 }
  0x64   :  { %v146_v31 = vadd.f32 %v145_v30, %v144_v28 }
  0x66   :  { %v147_v33 = vrot.slane %v146_v31, 1 }
  0x68   :  { %v148_v34 = vadd.f32 %v147_v33, %v146_v31 }
  0x6a   :  { %205 = vrcp.f32 %v148_v34 }
  0x6f   :  { %v204_v35 = vpop.eup %203 }
  0x70   :  { %v161_v43 = vmul.f32 0.6931472, %v204_v35 }
  0x72   :  { %v162_v47 = vsub.f32 %v363_v9, %v161_v43 }
  0x77   :  { %v206_v38 = vpop.eup %205 }
  0x78   :  { %v150_v42 = vmul.f32 %v206_v38, %v202_v24 }
  0x7a   :  { %v164_v45 = vadd.f32 %v163_v39, %v150_v42 }
  0x7c   :  { %v165_v48 = vmax.f32 %v164_v45, %v135_v44 }
  0x7e   :  { %v166_v49 = vmin.f32 %v165_v48, %v138_v46 }
  0x80   :  { %v167_v50 = vmul.f32 %v166_v49, %v162_v47 }
  0x82   :  { %168 = vst.msk [vmem:[#allocation8] sm:$0x3] %vm141_vm2, %v167_v50 }
  0x83   :  { %254 = shalt.err (!%p251_p5)
}
  0x84   :  { %s411_s8 = sld [smem:[#allocation12_spill]] }
  0x8a   :  { %178 = dma.vmem_to_hbm [thread:$0]  %s176_s4, 32, %s411_s8, [#allocation3]  }
  0x8b   :  { %267 = dma.done.wait [#allocation3], 32  }
  0x8c   :  { %268 = vsyncadd [#allocation3], 4294967264 }
  0x8d   :  { %182 = vsyncpa [#allocation3], 1 }
  0x8e   :  { %183 = vsyncpa [#allocation4], 1 }
  0x8f   :  { %184 = vsyncpa [#allocation6], 1 }

</bundles_post_ra>
